<compile_context>
chip_gen: v7x
topology: tpu7x:2x2x1
jax: 0.10.0
libtpu: 0.0.40
codegen_flags: <defaults>
</compile_context>

<pallas_src>
import functools

import jax
import jax.numpy as jnp
from jax import lax
from jax.experimental import pallas as pl
from jax.experimental.pallas import tpu as pltpu


# ---------------------------------------------------------------------------
# helpers
# ---------------------------------------------------------------------------
def _sublane(dtype):
    """Minimum sublane multiple for a dtype (8 f32, 16 bf16, 32 int8)."""
    return max(8, 32 // jnp.dtype(dtype).itemsize)


def _pick_tile(dim, cap, align):
    """Largest tile <= cap that divides `dim` and is a multiple of `align`.
    Falls back to the full dim (always a legal Mosaic block)."""
    if dim <= cap:
        return dim
    t = (cap // align) * align
    while t >= align:
        if dim % t == 0:
            return t
        t -= align
    return dim


def _pick_head_group(num_heads, head_dim):
    """Smallest head group whose packed width (g*D) is lane-dense (mult of
    128); falls back to all heads (width == C, always a legal block)."""
    for g in range(1, num_heads + 1):
        if num_heads % g == 0 and (g * head_dim) % 128 == 0:
            return g
    return num_heads


# ---------------------------------------------------------------------------
# Tiled matmul: y = x @ w (+ b), float32 VMEM accumulator over the K axis.
# ---------------------------------------------------------------------------
def _matmul_kernel(x_ref, w_ref, o_ref, acc_ref):
    @pl.when(pl.program_id(2) == 0)
    def _():
        acc_ref[...] = jnp.zeros_like(acc_ref)

    acc_ref[...] += jnp.dot(x_ref[...], w_ref[...],
                            preferred_element_type=jnp.float32)

    @pl.when(pl.program_id(2) == pl.num_programs(2) - 1)
    def _():
        o_ref[...] = acc_ref[...].astype(o_ref.dtype)


def _matmul_bias_kernel(x_ref, w_ref, b_ref, o_ref, acc_ref):
    @pl.when(pl.program_id(2) == 0)
    def _():
        acc_ref[...] = jnp.zeros_like(acc_ref)

    acc_ref[...] += jnp.dot(x_ref[...], w_ref[...],
                            preferred_element_type=jnp.float32)

    @pl.when(pl.program_id(2) == pl.num_programs(2) - 1)
    def _():
        o_ref[...] = (acc_ref[...] + b_ref[...].astype(jnp.float32)
                      ).astype(o_ref.dtype)


def pallas_matmul(x, w, bias=None, *, tm_cap=512, tn_cap=512, tk_cap=512):
    """x: (M, K); w: (K, Nout) (input-major); bias: (Nout,) or None."""
    M, K = x.shape
    K2, Nout = w.shape
    assert K == K2
    tm = _pick_tile(M, tm_cap, _sublane(x.dtype))
    tn = _pick_tile(Nout, tn_cap, 128)
    tk = _pick_tile(K, tk_cap, 128)
    grid = (M // tm, Nout // tn, K // tk)

    in_specs = [pl.BlockSpec((tm, tk), lambda i, j, k: (i, k)),
                pl.BlockSpec((tk, tn), lambda i, j, k: (k, j))]
    args = [x, w]
    kernel = _matmul_kernel
    if bias is not None:
        in_specs.append(pl.BlockSpec((1, tn), lambda i, j, k: (0, j)))
        args.append(bias.reshape(1, Nout))
        kernel = _matmul_bias_kernel

    return pl.pallas_call(
        kernel,
        out_shape=jax.ShapeDtypeStruct((M, Nout), x.dtype),
        grid=grid,
        in_specs=in_specs,
        out_specs=pl.BlockSpec((tm, tn), lambda i, j, k: (i, j)),
        scratch_shapes=[pltpu.VMEM((tm, tn), jnp.float32)],
        compiler_params=pltpu.CompilerParams(
            dimension_semantics=("parallel", "parallel", "arbitrary")),
    )(*args)


# ---------------------------------------------------------------------------
# Double-value attention.  Grid = (B, head-groups, query tiles).
# K / V1 / V2 blocks stay resident across the (innermost, "arbitrary") query
# tile axis; the value set is chosen by the BlockSpec index_map (no in-kernel
# (N, D) selects); output goes straight into (B, N, C).
# ---------------------------------------------------------------------------
def _make_attn_kernel(*, scale, m1, g, head_dim, tq, has_mixed):
    D = head_dim

    def body(q_ref, k_ref, va_ref, vb_ref, o_ref):
        q_start = pl.program_id(2) * tq
        q2 = q_ref[...]            # (tq, g*D)
        k2 = k_ref[...]            # (N,  g*D)
        va = va_ref[...]           # (N,  g*D) value set of the tile's 1st row
        if has_mixed:
            vb = vb_ref[...]       # (N,  g*D) value set of the tile's last row
            is_mixed = jnp.logical_and(q_start < m1, q_start + tq > m1)
            q_idx = q_start + lax.broadcasted_iota(jnp.int32,
                                                   (q2.shape[0], 1), 0)
            use_b = q_idx >= m1

        for j in range(g):
            sl = slice(j * D, (j + 1) * D)
            qj = q2[:, sl]
            kj = k2[:, sl]
            # scores: contract over D of both operands (no materialized k^T)
            s = lax.dot_general(qj, kj, (((1,), (1,)), ((), ())),
                                preferred_element_type=jnp.float32) * scale
            s = s - jnp.max(s, axis=-1, keepdims=True)
            p = jnp.exp(s)                                      # f32 (tq, N)
            inv = 1.0 / jnp.sum(p, axis=-1, keepdims=True)      # exact recip
            p = p.astype(va.dtype)                              # MXU dtype
            acc = jnp.dot(p, va[:, sl], preferred_element_type=jnp.float32)
            o_ref[:, sl] = (acc * inv).astype(o_ref.dtype)

            if has_mixed:
                # Only the (at most one per (b, head-group)) tile straddling
                # mod1_length executes this at runtime: one extra PV matmul
                # plus a (tq, D) row select.
                @pl.when(is_mixed)
                def _(p=p, acc=acc, inv=inv, sl=sl):
                    acc_b = jnp.dot(p, vb[:, sl],
                                    preferred_element_type=jnp.float32)
                    fixed = jnp.where(use_b, acc_b, acc)
                    o_ref[:, sl] = (fixed * inv).astype(o_ref.dtype)

    if has_mixed:
        def kernel(q_ref, k_ref, va_ref, vb_ref, o_ref):
            body(q_ref, k_ref, va_ref, vb_ref, o_ref)
    else:
        def kernel(q_ref, k_ref, va_ref, o_ref):
            body(q_ref, k_ref, va_ref, None, o_ref)
    return kernel


def pallas_doublevalue_attention(qh, kh, v12, *, scale, m1, head_dim,
                                 tq_cap=128):
    """qh, kh: (B, Hg, N, g*D); v12: (2, B, Hg, N, g*D) = [v1, v2].
    Returns attention output already laid out as (B, N, C)."""
    B, Hg, N, gD = qh.shape
    g = gD // head_dim
    C = Hg * gD
    tq = N if N <= tq_cap else max(8, (tq_cap // 8) * 8)
    nq = pl.cdiv(N, tq)
    # A "mixed" tile (straddling mod1_length) only exists when the boundary
    # is not aligned to the tile grid -> skip that code path statically.
    has_mixed = (0 < m1 < N) and (m1 % tq != 0)

    kernel = _make_attn_kernel(scale=scale, m1=m1, g=g, head_dim=head_dim,
                               tq=tq, has_mixed=has_mixed)

    q_spec = pl.BlockSpec((None, None, tq, gD), lambda b, h, i: (b, h, i, 0))
    k_spec = pl.BlockSpec((None, None, N, gD), lambda b, h, i: (b, h, 0, 0))

    def va_map(b, h, i):
        # value set for the first row of the tile: 0 -> v1, 1 -> v2
        return (jnp.where(i * tq >= m1, 1, 0), b, h, 0, 0)

    va_spec = pl.BlockSpec((None, None, None, N, gD), va_map)
    in_specs = [q_spec, k_spec, va_spec]
    inputs = [qh, kh, v12]

    if has_mixed:
        def vb_map(b, h, i):
            # value set for the last row of the tile (differs only on the
            # single straddling tile; otherwise the block index is unchanged
            # and Pallas skips the re-DMA).
            return (jnp.where((i + 1) * tq > m1, 1, 0), b, h, 0, 0)
        in_specs.append(pl.BlockSpec((None, None, None, N, gD), vb_map))
        inputs.append(v12)

    o_spec = pl.BlockSpec((None, tq, gD), lambda b, h, i: (b, i, h))

    return pl.pallas_call(
        kernel,
        out_shape=jax.ShapeDtypeStruct((B, N, C), qh.dtype),
        grid=(B, Hg, nq),
        in_specs=in_specs,
        out_specs=o_spec,
        compiler_params=pltpu.CompilerParams(
            dimension_semantics=("parallel", "parallel", "arbitrary")),
    )(*inputs)


# ---------------------------------------------------------------------------
# Parameter prep (hoisted out of the per-call forward).
# ---------------------------------------------------------------------------
def prepare_params(params):
    w_fused = jnp.concatenate(
        [params["wq"].T, params["wk"].T, params["wv"].T, params["wvc"].T],
        axis=1)                                          # (C, 4C)
    return {"w_fused": w_fused, "wproj_t": params["wproj"].T,
            "bproj": params["bproj"]}


# ---------------------------------------------------------------------------
# Full module forward (eval mode: attn_drop = proj_drop = identity).
# ---------------------------------------------------------------------------
def attention_multi_doublevalue(x, prepared, *, num_heads, mod1_length,
                                attn_q_tile=128):
    B, N, C = x.shape
    H = num_heads
    D = C // H
    scale = D ** (-0.5)
    g = _pick_head_group(H, D)
    Hg = H // g

    # 1) fused q/k/v/v_cross projection: x read once, one launch, MXU N = 4C.
    x2d = x.reshape(B * N, C)
    qkvv = pallas_matmul(x2d, prepared["w_fused"])       # (B*N, 4C), no bias

    # 2) single repack pass: head-group split + the static v1/v2 modality swap
    #    folded together (so no per-tile value select runs inside the kernel).
    # TODO(synk): could be fused into the projection matmul's out_specs to
    # save one more HBM round trip for q/k.
    t = qkvv.reshape(B, N, 4, Hg, g * D)
    qh = t[:, :, 0].transpose(0, 2, 1, 3)                # (B, Hg, N, g*D)
    kh = t[:, :, 1].transpose(0, 2, 1, 3)
    vh = t[:, :, 2].transpose(0, 2, 1, 3)
    vch = t[:, :, 3].transpose(0, 2, 1, 3)
    tok_is_mod2 = (jnp.arange(N) >= mod1_length).reshape(1, 1, N, 1)
    v12 = jnp.stack([jnp.where(tok_is_mod2, vch, vh),    # v1
                     jnp.where(tok_is_mod2, vh, vch)],   # v2
                    axis=0)                              # (2, B, Hg, N, g*D)

    # 3) attention; output lands directly in (B, N, C) (no output transpose).
    o = pallas_doublevalue_attention(qh, kh, v12, scale=scale, m1=mod1_length,
                                     head_dim=D, tq_cap=attn_q_tile)

    # 4) output projection.
    y = pallas_matmul(o.reshape(B * N, C), prepared["wproj_t"],
                      bias=prepared["bproj"])
    return y.reshape(B, N, C)


# ---------------------------------------------------------------------------
# Pure-JAX reference (mirrors the PyTorch forward).
# ---------------------------------------------------------------------------
def reference_forward(x, params, *, num_heads, mod1_length):
    B, N, C = x.shape
    D = C // num_heads
    scale = D ** (-0.5)

    def lin(t, w, b=None):
        y = t @ w.T
        return y if b is None else y + b

    def heads(t):
        return t.reshape(B, N, num_heads, D).transpose(0, 2, 1, 3)

    q = heads(lin(x, params["wq"]))
    k = heads(lin(x, params["wk"]))
    v = heads(lin(x, params["wv"]))
    vc = heads(lin(x, params["wvc"]))

    attn = jnp.einsum("bhnd,bhmd->bhnm", q, k) * scale
    attn = jax.nn.softmax(attn, axis=-1)

    m1 = mod1_length
    v1 = jnp.concatenate((v[:, :, :m1], vc[:, :, m1:]), axis=-2)
    v2 = jnp.concatenate((vc[:, :, :m1], v[:, :, m1:]), axis=-2)
    x_a = attn[:, :, :m1] @ v1
    x_v = attn[:, :, m1:] @ v2
    out = jnp.concatenate((x_a, x_v), axis=-2).transpose(0, 2, 1, 3).reshape(B, N, C)
    return lin(out, params["wproj"], params["bproj"])


# ---------------------------------------------------------------------------
# Self-test
# ---------------------------------------------------------------------------
def _run_case(key, *, B, C, num_heads, mod1_length, mod2_length, attn_q_tile):
    N = mod1_length + mod2_length
    kx, kq, kk, kv, kvc, kp, kb = jax.random.split(key, 7)
    x = jax.random.normal(kx, (B, N, C), dtype=jnp.float32)
    params = {
        "wq":    0.05 * jax.random.normal(kq,  (C, C), dtype=jnp.float32),
        "wk":    0.05 * jax.random.normal(kk,  (C, C), dtype=jnp.float32),
        "wv":    0.05 * jax.random.normal(kv,  (C, C), dtype=jnp.float32),
        "wvc":   0.05 * jax.random.normal(kvc, (C, C), dtype=jnp.float32),
        "wproj": 0.05 * jax.random.normal(kp,  (C, C), dtype=jnp.float32),
        "bproj": 0.05 * jax.random.normal(kb,  (C,),   dtype=jnp.float32),
    }
    prepared = prepare_params(params)       # one-time weight fusion (hoisted)

    fwd = jax.jit(functools.partial(attention_multi_doublevalue,
                                    num_heads=num_heads,
                                    mod1_length=mod1_length,
                                    attn_q_tile=attn_q_tile))
    out = fwd(x, prepared)
    jax.block_until_ready(out)

    ref = reference_forward(x, params, num_heads=num_heads,
                            mod1_length=mod1_length)
    assert out.shape == (B, N, C)
    assert jnp.allclose(out, ref, atol=1e-2, rtol=1e-2), "mismatch vs reference"


if __name__ == "__main__":
    key = jax.random.PRNGKey(0)
    k1, k2, k3 = jax.random.split(key, 3)

    # Case 1: a single query tile straddling the modality boundary
    # (exercises the runtime mixed fix-up path).
    _run_case(k1, B=2, C=32, num_heads=4,
              mod1_length=5, mod2_length=3, attn_q_tile=128)

    # Case 2: query tiling (tq=8) with the boundary aligned to the tile grid
    # -> the mixed path is statically removed; also exercises a partial final
    # query tile (N=21).
    _run_case(k2, B=2, C=32, num_heads=4,
              mod1_length=16, mod2_length=5, attn_q_tile=8)

    # Case 3: lane-dense head grouping path (D=128 -> g=1, Hg=2) with an
    # unaligned boundary.
    _run_case(k3, B=1, C=256, num_heads=2,
              mod1_length=9, mod2_length=7, attn_q_tile=128)

    print("KERNEL_OK")
</pallas_src>

<mosaic_0001>
module attributes {stable_mosaic.version = 11 : i64} {
  func.func @_matmul_kernel(%arg0: i32, %arg1: i32, %arg2: i32, %arg3: memref<16x32xf32, #tpu.memory_space<vmem>>, %arg4: memref<32x128xf32, #tpu.memory_space<vmem>>, %arg5: memref<16x128xf32, #tpu.memory_space<vmem>>, %arg6: memref<16x128xf32, #tpu.memory_space<vmem>>) attributes {dimension_semantics = [#tpu.dimension_semantics<parallel>, #tpu.dimension_semantics<parallel>, #tpu.dimension_semantics<arbitrary>], iteration_bounds = array<i64: 1, 1, 1>, scalar_prefetch = 0 : i64, scratch_operands = 1 : i64, tpu.core_type = #tpu.core_type<tc>, window_params = [{transform_indices = @transform_0, window_bounds = array<i64: 16, 32>}, {transform_indices = @transform_1, window_bounds = array<i64: 32, 128>}, {transform_indices = @transform_2, window_bounds = array<i64: 16, 128>}]} {
    %c0_i32 = arith.constant 0 : i32
    %0 = arith.cmpi eq, %arg2, %c0_i32 : i32
    %1 = arith.extui %0 : i1 to i32
    %c0_i32_0 = arith.constant 0 : i32
    %2 = arith.cmpi ne, %1, %c0_i32_0 : i32
    scf.if %2 {
      %cst_10 = arith.constant 0.000000e+00 : f32
      %12 = vector.broadcast %cst_10 : f32 to vector<16x128xf32>
      %c0_11 = arith.constant 0 : index
      %c0_12 = arith.constant 0 : index
      %13 = vector.load %arg6[%c0_11, %c0_12] : memref<16x128xf32, #tpu.memory_space<vmem>>, vector<16x128xf32>
      tpu.vector_store %arg6[%c0_11, %c0_12], %12 {strides = array<i32>} : memref<16x128xf32, #tpu.memory_space<vmem>>, vector<16x128xf32>,
    } else {
    }
    %c0 = arith.constant 0 : index
    %c0_1 = arith.constant 0 : index
    %3 = vector.load %arg6[%c0, %c0_1] : memref<16x128xf32, #tpu.memory_space<vmem>>, vector<16x128xf32>
    %c0_2 = arith.constant 0 : index
    %c0_3 = arith.constant 0 : index
    %4 = vector.load %arg3[%c0_2, %c0_3] : memref<16x32xf32, #tpu.memory_space<vmem>>, vector<16x32xf32>
    %c0_4 = arith.constant 0 : index
    %c0_5 = arith.constant 0 : index
    %5 = vector.load %arg4[%c0_4, %c0_5] : memref<32x128xf32, #tpu.memory_space<vmem>>, vector<32x128xf32>
    %cst = arith.constant dense<0.000000e+00> : vector<16x128xf32>
    %6 = tpu.matmul %4, %5, %cst {dimension_numbers = #tpu.dot_dimension_numbers<[1], [0], [0], [1], [0, 0, 1, 1], [], []>} : vector<16x32xf32>, vector<32x128xf32>, vector<16x128xf32> -> vector<16x128xf32>
    %7 = arith.addf %3, %6 : vector<16x128xf32>
    %c0_6 = arith.constant 0 : index
    %c0_7 = arith.constant 0 : index
    %8 = vector.load %arg6[%c0_6, %c0_7] : memref<16x128xf32, #tpu.memory_space<vmem>>, vector<16x128xf32>
    tpu.vector_store %arg6[%c0_6, %c0_7], %7 {strides = array<i32>} : memref<16x128xf32, #tpu.memory_space<vmem>>, vector<16x128xf32>,
    %c0_i32_8 = arith.constant 0 : i32
    %9 = arith.cmpi eq, %arg2, %c0_i32_8 : i32
    %10 = arith.extui %9 : i1 to i32
    %c0_i32_9 = arith.constant 0 : i32
    %11 = arith.cmpi ne, %10, %c0_i32_9 : i32
    scf.if %11 {
      %c0_10 = arith.constant 0 : index
      %c0_11 = arith.constant 0 : index
      %12 = vector.load %arg6[%c0_10, %c0_11] : memref<16x128xf32, #tpu.memory_space<vmem>>, vector<16x128xf32>
      %c0_12 = arith.constant 0 : index
      %c0_13 = arith.constant 0 : index
      %13 = vector.load %arg5[%c0_12, %c0_13] : memref<16x128xf32, #tpu.memory_space<vmem>>, vector<16x128xf32>
      tpu.vector_store %arg5[%c0_12, %c0_13], %12 {strides = array<i32>} : memref<16x128xf32, #tpu.memory_space<vmem>>, vector<16x128xf32>,
    } else {
    }
    return
  }
  func.func @transform_0(%arg0: i32, %arg1: i32, %arg2: i32) -> (i32, i32) {
    %c0_i32 = arith.constant 0 : i32
    return %arg0, %arg2 : i32, i32
  }
  func.func @transform_1(%arg0: i32, %arg1: i32, %arg2: i32) -> (i32, i32) {
    %c0_i32 = arith.constant 0 : i32
    return %arg2, %arg1 : i32, i32
  }
  func.func @transform_2(%arg0: i32, %arg1: i32, %arg2: i32) -> (i32, i32) {
    %c0_i32 = arith.constant 0 : i32
    return %arg0, %arg1 : i32, i32
  }
}

module attributes {stable_mosaic.version = 11 : i64} {
  func.func @_matmul_bias_kernel(%arg0: i32, %arg1: i32, %arg2: i32, %arg3: memref<16x32xf32, #tpu.memory_space<vmem>>, %arg4: memref<32x32xf32, #tpu.memory_space<vmem>>, %arg5: memref<1x32xf32, #tpu.memory_space<vmem>>, %arg6: memref<16x32xf32, #tpu.memory_space<vmem>>, %arg7: memref<16x32xf32, #tpu.memory_space<vmem>>) attributes {dimension_semantics = [#tpu.dimension_semantics<parallel>, #tpu.dimension_semantics<parallel>, #tpu.dimension_semantics<arbitrary>], iteration_bounds = array<i64: 1, 1, 1>, scalar_prefetch = 0 : i64, scratch_operands = 1 : i64, tpu.core_type = #tpu.core_type<tc>, window_params = [{transform_indices = @transform_0, window_bounds = array<i64: 16, 32>}, {transform_indices = @transform_1, window_bounds = array<i64: 32, 32>}, {transform_indices = @transform_2, window_bounds = array<i64: 1, 32>}, {transform_indices = @transform_3, window_bounds = array<i64: 16, 32>}]} {
    %c0_i32 = arith.constant 0 : i32
    %0 = arith.cmpi eq, %arg2, %c0_i32 : i32
    %1 = arith.extui %0 : i1 to i32
    %c0_i32_0 = arith.constant 0 : i32
    %2 = arith.cmpi ne, %1, %c0_i32_0 : i32
    scf.if %2 {
      %cst_10 = arith.constant 0.000000e+00 : f32
      %12 = vector.broadcast %cst_10 : f32 to vector<16x32xf32>
      %c0_11 = arith.constant 0 : index
      %c0_12 = arith.constant 0 : index
      %13 = vector.load %arg7[%c0_11, %c0_12] : memref<16x32xf32, #tpu.memory_space<vmem>>, vector<16x32xf32>
      tpu.vector_store %arg7[%c0_11, %c0_12], %12 {strides = array<i32>} : memref<16x32xf32, #tpu.memory_space<vmem>>, vector<16x32xf32>,
    } else {
    }
    %c0 = arith.constant 0 : index
    %c0_1 = arith.constant 0 : index
    %3 = vector.load %arg7[%c0, %c0_1] : memref<16x32xf32, #tpu.memory_space<vmem>>, vector<16x32xf32>
    %c0_2 = arith.constant 0 : index
    %c0_3 = arith.constant 0 : index
    %4 = vector.load %arg3[%c0_2, %c0_3] : memref<16x32xf32, #tpu.memory_space<vmem>>, vector<16x32xf32>
    %c0_4 = arith.constant 0 : index
    %c0_5 = arith.constant 0 : index
    %5 = vector.load %arg4[%c0_4, %c0_5] : memref<32x32xf32, #tpu.memory_space<vmem>>, vector<32x32xf32>
    %cst = arith.constant dense<0.000000e+00> : vector<16x32xf32>
    %6 = tpu.matmul %4, %5, %cst {dimension_numbers = #tpu.dot_dimension_numbers<[1], [0], [0], [1], [0, 0, 1, 1], [], []>} : vector<16x32xf32>, vector<32x32xf32>, vector<16x32xf32> -> vector<16x32xf32>
    %7 = arith.addf %3, %6 : vector<16x32xf32>
    %c0_6 = arith.constant 0 : index
    %c0_7 = arith.constant 0 : index
    %8 = vector.load %arg7[%c0_6, %c0_7] : memref<16x32xf32, #tpu.memory_space<vmem>>, vector<16x32xf32>
    tpu.vector_store %arg7[%c0_6, %c0_7], %7 {strides = array<i32>} : memref<16x32xf32, #tpu.memory_space<vmem>>, vector<16x32xf32>,
    %c0_i32_8 = arith.constant 0 : i32
    %9 = arith.cmpi eq, %arg2, %c0_i32_8 : i32
    %10 = arith.extui %9 : i1 to i32
    %c0_i32_9 = arith.constant 0 : i32
    %11 = arith.cmpi ne, %10, %c0_i32_9 : i32
    scf.if %11 {
      %c0_10 = arith.constant 0 : index
      %c0_11 = arith.constant 0 : index
      %12 = vector.load %arg7[%c0_10, %c0_11] : memref<16x32xf32, #tpu.memory_space<vmem>>, vector<16x32xf32>
      %c0_12 = arith.constant 0 : index
      %c0_13 = arith.constant 0 : index
      %13 = vector.load %arg5[%c0_12, %c0_13] : memref<1x32xf32, #tpu.memory_space<vmem>>, vector<1x32xf32>
      %14 = vector.broadcast %13 : vector<1x32xf32> to vector<16x32xf32>
      %15 = arith.addf %12, %14 : vector<16x32xf32>
      %c0_14 = arith.constant 0 : index
      %c0_15 = arith.constant 0 : index
      %16 = vector.load %arg6[%c0_14, %c0_15] : memref<16x32xf32, #tpu.memory_space<vmem>>, vector<16x32xf32>
      tpu.vector_store %arg6[%c0_14, %c0_15], %15 {strides = array<i32>} : memref<16x32xf32, #tpu.memory_space<vmem>>, vector<16x32xf32>,
    } else {
    }
    return
  }
  func.func @transform_0(%arg0: i32, %arg1: i32, %arg2: i32) -> (i32, i32) {
    %c0_i32 = arith.constant 0 : i32
    return %arg0, %arg2 : i32, i32
  }
  func.func @transform_1(%arg0: i32, %arg1: i32, %arg2: i32) -> (i32, i32) {
    %c0_i32 = arith.constant 0 : i32
    return %arg2, %arg1 : i32, i32
  }
  func.func @transform_2(%arg0: i32, %arg1: i32, %arg2: i32) -> (i32, i32) {
    %c0_i32 = arith.constant 0 : i32
    %c0_i32_0 = arith.constant 0 : i32
    return %c0_i32, %arg1 : i32, i32
  }
  func.func @transform_3(%arg0: i32, %arg1: i32, %arg2: i32) -> (i32, i32) {
    %c0_i32 = arith.constant 0 : i32
    return %arg0, %arg1 : i32, i32
  }
}

module attributes {stable_mosaic.version = 11 : i64} {
  func.func @kernel(%arg0: i32, %arg1: i32, %arg2: i32, %arg3: memref<1x1x8x32xf32, #tpu.memory_space<vmem>>, %arg4: memref<1x1x8x32xf32, #tpu.memory_space<vmem>>, %arg5: memref<1x1x1x8x32xf32, #tpu.memory_space<vmem>>, %arg6: memref<1x1x1x8x32xf32, #tpu.memory_space<vmem>>, %arg7: memref<1x8x32xf32, #tpu.memory_space<vmem>>) attributes {dimension_semantics = [#tpu.dimension_semantics<parallel>, #tpu.dimension_semantics<parallel>, #tpu.dimension_semantics<arbitrary>], iteration_bounds = array<i64: 2, 1, 1>, scalar_prefetch = 0 : i64, scratch_operands = 0 : i64, tpu.core_type = #tpu.core_type<tc>, window_params = [{transform_indices = @transform_0, window_bounds = array<i64: 1, 1, 8, 32>}, {transform_indices = @transform_1, window_bounds = array<i64: 1, 1, 8, 32>}, {transform_indices = @transform_2, window_bounds = array<i64: 1, 1, 1, 8, 32>}, {transform_indices = @transform_3, window_bounds = array<i64: 1, 1, 1, 8, 32>}, {transform_indices = @transform_4, window_bounds = array<i64: 1, 8, 32>}]} {
    %c8_i32 = arith.constant 8 : i32
    %0 = arith.muli %arg2, %c8_i32 : i32
    %c0 = arith.constant 0 : index
    %c0_0 = arith.constant 0 : index
    %c0_1 = arith.constant 0 : index
    %c0_2 = arith.constant 0 : index
    %1 = vector.load %arg3[%c0, %c0_0, %c0_1, %c0_2] : memref<1x1x8x32xf32, #tpu.memory_space<vmem>>, vector<1x1x8x32xf32>
    %2 = vector.shape_cast %1 : vector<1x1x8x32xf32> to vector<8x32xf32>
    %c0_3 = arith.constant 0 : index
    %c0_4 = arith.constant 0 : index
    %c0_5 = arith.constant 0 : index
    %c0_6 = arith.constant 0 : index
    %3 = vector.load %arg4[%c0_3, %c0_4, %c0_5, %c0_6] : memref<1x1x8x32xf32, #tpu.memory_space<vmem>>, vector<1x1x8x32xf32>
    %4 = vector.shape_cast %3 : vector<1x1x8x32xf32> to vector<8x32xf32>
    %c0_7 = arith.constant 0 : index
    %c0_8 = arith.constant 0 : index
    %c0_9 = arith.constant 0 : index
    %c0_10 = arith.constant 0 : index
    %c0_11 = arith.constant 0 : index
    %5 = vector.load %arg5[%c0_7, %c0_8, %c0_9, %c0_10, %c0_11] : memref<1x1x1x8x32xf32, #tpu.memory_space<vmem>>, vector<1x1x1x8x32xf32>
    %6 = vector.shape_cast %5 : vector<1x1x1x8x32xf32> to vector<8x32xf32>
    %c0_12 = arith.constant 0 : index
    %c0_13 = arith.constant 0 : index
    %c0_14 = arith.constant 0 : index
    %c0_15 = arith.constant 0 : index
    %c0_16 = arith.constant 0 : index
    %7 = vector.load %arg6[%c0_12, %c0_13, %c0_14, %c0_15, %c0_16] : memref<1x1x1x8x32xf32, #tpu.memory_space<vmem>>, vector<1x1x1x8x32xf32>
    %8 = vector.shape_cast %7 : vector<1x1x1x8x32xf32> to vector<8x32xf32>
    %c5_i32 = arith.constant 5 : i32
    %9 = arith.cmpi slt, %0, %c5_i32 : i32
    %c8_i32_17 = arith.constant 8 : i32
    %10 = arith.addi %0, %c8_i32_17 : i32
    %c5_i32_18 = arith.constant 5 : i32
    %11 = arith.cmpi sgt, %10, %c5_i32_18 : i32
    %12 = arith.andi %9, %11 : i1
    %13 = tpu.iota {dimensions = array<i32: 0>} : vector<8x1xi32>
    %14 = vector.broadcast %0 : i32 to vector<8x1xi32>
    %15 = arith.addi %14, %13 : vector<8x1xi32>
    %c5_i32_19 = arith.constant 5 : i32
    %16 = vector.broadcast %c5_i32_19 : i32 to vector<8x1xi32>
    %17 = arith.cmpi sge, %15, %16 : vector<8x1xi32>
    %18 = vector.extract_strided_slice %2 {offsets = [0, 0], sizes = [8, 8], strides = [1, 1]} : vector<8x32xf32> to vector<8x8xf32>
    %19 = vector.extract_strided_slice %4 {offsets = [0, 0], sizes = [8, 8], strides = [1, 1]} : vector<8x32xf32> to vector<8x8xf32>
    %cst = arith.constant dense<0.000000e+00> : vector<8x8xf32>
    %20 = tpu.matmul %18, %19, %cst {dimension_numbers = #tpu.dot_dimension_numbers<[1], [1], [0], [0], [0, 0, 1, 0], [], []>} : vector<8x8xf32>, vector<8x8xf32>, vector<8x8xf32> -> vector<8x8xf32>
    %cst_20 = arith.constant 0.353553385 : f32
    %21 = vector.broadcast %cst_20 : f32 to vector<8x8xf32>
    %22 = arith.mulf %20, %21 : vector<8x8xf32>
    %cst_21 = arith.constant dense<0xFF800000> : vector<8xf32>
    %23 = vector.multi_reduction <maximumf>, %22, %cst_21 [1] : vector<8x8xf32> to vector<8xf32>
    %24 = vector.shape_cast %23 : vector<8xf32> to vector<8x1xf32>
    %25 = vector.broadcast %24 : vector<8x1xf32> to vector<8x8xf32>
    %26 = arith.subf %22, %25 : vector<8x8xf32>
    %27 = math.exp %26 : vector<8x8xf32>
    %cst_22 = arith.constant dense<0.000000e+00> : vector<8xf32>
    %28 = vector.multi_reduction <add>, %27, %cst_22 [1] : vector<8x8xf32> to vector<8xf32>
    %29 = vector.shape_cast %28 : vector<8xf32> to vector<8x1xf32>
    %cst_23 = arith.constant 1.000000e+00 : f32
    %30 = vector.broadcast %cst_23 : f32 to vector<8x1xf32>
    %31 = arith.divf %30, %29 : vector<8x1xf32>
    %32 = vector.extract_strided_slice %6 {offsets = [0, 0], sizes = [8, 8], strides = [1, 1]} : vector<8x32xf32> to vector<8x8xf32>
    %cst_24 = arith.constant dense<0.000000e+00> : vector<8x8xf32>
    %33 = tpu.matmul %27, %32, %cst_24 {dimension_numbers = #tpu.dot_dimension_numbers<[1], [0], [0], [1], [0, 0, 1, 1], [], []>} : vector<8x8xf32>, vector<8x8xf32>, vector<8x8xf32> -> vector<8x8xf32>
    %34 = vector.broadcast %31 : vector<8x1xf32> to vector<8x8xf32>
    %35 = arith.mulf %33, %34 : vector<8x8xf32>
    %c0_25 = arith.constant 0 : index
    %c0_26 = arith.constant 0 : index
    %c0_27 = arith.constant 0 : index
    %36 = vector.load %arg7[%c0_25, %c0_26, %c0_27] : memref<1x8x32xf32, #tpu.memory_space<vmem>>, vector<1x8x8xf32>
    %37 = vector.shape_cast %36 : vector<1x8x8xf32> to vector<8x8xf32>
    %38 = vector.shape_cast %35 : vector<8x8xf32> to vector<1x8x8xf32>
    tpu.vector_store %arg7[%c0_25, %c0_26, %c0_27], %38 {strides = array<i32>} : memref<1x8x32xf32, #tpu.memory_space<vmem>>, vector<1x8x8xf32>,
    %39 = arith.extui %12 : i1 to i32
    %c0_i32 = arith.constant 0 : i32
    %40 = arith.cmpi ne, %39, %c0_i32 : i32
    scf.if %40 {
      %110 = vector.extract_strided_slice %8 {offsets = [0, 0], sizes = [8, 8], strides = [1, 1]} : vector<8x32xf32> to vector<8x8xf32>
      %cst_55 = arith.constant dense<0.000000e+00> : vector<8x8xf32>
      %111 = tpu.matmul %27, %110, %cst_55 {dimension_numbers = #tpu.dot_dimension_numbers<[1], [0], [0], [1], [0, 0, 1, 1], [], []>} : vector<8x8xf32>, vector<8x8xf32>, vector<8x8xf32> -> vector<8x8xf32>
      %112 = vector.shape_cast %17 : vector<8x1xi1> to vector<8x1xi1>
      %113 = vector.broadcast %112 : vector<8x1xi1> to vector<8x8xi1>
      %114 = arith.select %113, %111, %33 : vector<8x8xi1>, vector<8x8xf32>
      %115 = vector.broadcast %31 : vector<8x1xf32> to vector<8x8xf32>
      %116 = arith.mulf %114, %115 : vector<8x8xf32>
      %c0_56 = arith.constant 0 : index
      %c0_57 = arith.constant 0 : index
      %c0_58 = arith.constant 0 : index
      %117 = vector.load %arg7[%c0_56, %c0_57, %c0_58] : memref<1x8x32xf32, #tpu.memory_space<vmem>>, vector<1x8x8xf32>
      %118 = vector.shape_cast %117 : vector<1x8x8xf32> to vector<8x8xf32>
      %119 = vector.shape_cast %116 : vector<8x8xf32> to vector<1x8x8xf32>
      tpu.vector_store %arg7[%c0_56, %c0_57, %c0_58], %119 {strides = array<i32>} : memref<1x8x32xf32, #tpu.memory_space<vmem>>, vector<1x8x8xf32>,
    } else {
    }
    %41 = vector.extract_strided_slice %2 {offsets = [0, 8], sizes = [8, 8], strides = [1, 1]} : vector<8x32xf32> to vector<8x8xf32>
    %42 = vector.extract_strided_slice %4 {offsets = [0, 8], sizes = [8, 8], strides = [1, 1]} : vector<8x32xf32> to vector<8x8xf32>
    %cst_28 = arith.constant dense<0.000000e+00> : vector<8x8xf32>
    %43 = tpu.matmul %41, %42, %cst_28 {dimension_numbers = #tpu.dot_dimension_numbers<[1], [1], [0], [0], [0, 0, 1, 0], [], []>} : vector<8x8xf32>, vector<8x8xf32>, vector<8x8xf32> -> vector<8x8xf32>
    %cst_29 = arith.constant 0.353553385 : f32
    %44 = vector.broadcast %cst_29 : f32 to vector<8x8xf32>
    %45 = arith.mulf %43, %44 : vector<8x8xf32>
    %cst_30 = arith.constant dense<0xFF800000> : vector<8xf32>
    %46 = vector.multi_reduction <maximumf>, %45, %cst_30 [1] : vector<8x8xf32> to vector<8xf32>
    %47 = vector.shape_cast %46 : vector<8xf32> to vector<8x1xf32>
    %48 = vector.broadcast %47 : vector<8x1xf32> to vector<8x8xf32>
    %49 = arith.subf %45, %48 : vector<8x8xf32>
    %50 = math.exp %49 : vector<8x8xf32>
    %cst_31 = arith.constant dense<0.000000e+00> : vector<8xf32>
    %51 = vector.multi_reduction <add>, %50, %cst_31 [1] : vector<8x8xf32> to vector<8xf32>
    %52 = vector.shape_cast %51 : vector<8xf32> to vector<8x1xf32>
    %cst_32 = arith.constant 1.000000e+00 : f32
    %53 = vector.broadcast %cst_32 : f32 to vector<8x1xf32>
    %54 = arith.divf %53, %52 : vector<8x1xf32>
    %55 = vector.extract_strided_slice %6 {offsets = [0, 8], sizes = [8, 8], strides = [1, 1]} : vector<8x32xf32> to vector<8x8xf32>
    %cst_33 = arith.constant dense<0.000000e+00> : vector<8x8xf32>
    %56 = tpu.matmul %50, %55, %cst_33 {dimension_numbers = #tpu.dot_dimension_numbers<[1], [0], [0], [1], [0, 0, 1, 1], [], []>} : vector<8x8xf32>, vector<8x8xf32>, vector<8x8xf32> -> vector<8x8xf32>
    %57 = vector.broadcast %54 : vector<8x1xf32> to vector<8x8xf32>
    %58 = arith.mulf %56, %57 : vector<8x8xf32>
    %c0_34 = arith.constant 0 : index
    %c0_35 = arith.constant 0 : index
    %c8 = arith.constant 8 : index
    %59 = vector.load %arg7[%c0_34, %c0_35, %c8] : memref<1x8x32xf32, #tpu.memory_space<vmem>>, vector<1x8x8xf32>
    %60 = vector.shape_cast %59 : vector<1x8x8xf32> to vector<8x8xf32>
    %61 = vector.shape_cast %58 : vector<8x8xf32> to vector<1x8x8xf32>
    tpu.vector_store %arg7[%c0_34, %c0_35, %c8], %61 {strides = array<i32>} : memref<1x8x32xf32, #tpu.memory_space<vmem>>, vector<1x8x8xf32>,
    %62 = arith.extui %12 : i1 to i32
    %c0_i32_36 = arith.constant 0 : i32
    %63 = arith.cmpi ne, %62, %c0_i32_36 : i32
    scf.if %63 {
      %110 = vector.extract_strided_slice %8 {offsets = [0, 8], sizes = [8, 8], strides = [1, 1]} : vector<8x32xf32> to vector<8x8xf32>
      %cst_55 = arith.constant dense<0.000000e+00> : vector<8x8xf32>
      %111 = tpu.matmul %50, %110, %cst_55 {dimension_numbers = #tpu.dot_dimension_numbers<[1], [0], [0], [1], [0, 0, 1, 1], [], []>} : vector<8x8xf32>, vector<8x8xf32>, vector<8x8xf32> -> vector<8x8xf32>
      %112 = vector.shape_cast %17 : vector<8x1xi1> to vector<8x1xi1>
      %113 = vector.broadcast %112 : vector<8x1xi1> to vector<8x8xi1>
      %114 = arith.select %113, %111, %56 : vector<8x8xi1>, vector<8x8xf32>
      %115 = vector.broadcast %54 : vector<8x1xf32> to vector<8x8xf32>
      %116 = arith.mulf %114, %115 : vector<8x8xf32>
      %c0_56 = arith.constant 0 : index
      %c0_57 = arith.constant 0 : index
      %c8_58 = arith.constant 8 : index
      %117 = vector.load %arg7[%c0_56, %c0_57, %c8_58] : memref<1x8x32xf32, #tpu.memory_space<vmem>>, vector<1x8x8xf32>
      %118 = vector.shape_cast %117 : vector<1x8x8xf32> to vector<8x8xf32>
      %119 = vector.shape_cast %116 : vector<8x8xf32> to vector<1x8x8xf32>
      tpu.vector_store %arg7[%c0_56, %c0_57, %c8_58], %119 {strides = array<i32>} : memref<1x8x32xf32, #tpu.memory_space<vmem>>, vector<1x8x8xf32>,
    } else {
    }
    %64 = vector.extract_strided_slice %2 {offsets = [0, 16], sizes = [8, 8], strides = [1, 1]} : vector<8x32xf32> to vector<8x8xf32>
    %65 = vector.extract_strided_slice %4 {offsets = [0, 16], sizes = [8, 8], strides = [1, 1]} : vector<8x32xf32> to vector<8x8xf32>
    %cst_37 = arith.constant dense<0.000000e+00> : vector<8x8xf32>
    %66 = tpu.matmul %64, %65, %cst_37 {dimension_numbers = #tpu.dot_dimension_numbers<[1], [1], [0], [0], [0, 0, 1, 0], [], []>} : vector<8x8xf32>, vector<8x8xf32>, vector<8x8xf32> -> vector<8x8xf32>
    %cst_38 = arith.constant 0.353553385 : f32
    %67 = vector.broadcast %cst_38 : f32 to vector<8x8xf32>
    %68 = arith.mulf %66, %67 : vector<8x8xf32>
    %cst_39 = arith.constant dense<0xFF800000> : vector<8xf32>
    %69 = vector.multi_reduction <maximumf>, %68, %cst_39 [1] : vector<8x8xf32> to vector<8xf32>
    %70 = vector.shape_cast %69 : vector<8xf32> to vector<8x1xf32>
    %71 = vector.broadcast %70 : vector<8x1xf32> to vector<8x8xf32>
    %72 = arith.subf %68, %71 : vector<8x8xf32>
    %73 = math.exp %72 : vector<8x8xf32>
    %cst_40 = arith.constant dense<0.000000e+00> : vector<8xf32>
    %74 = vector.multi_reduction <add>, %73, %cst_40 [1] : vector<8x8xf32> to vector<8xf32>
    %75 = vector.shape_cast %74 : vector<8xf32> to vector<8x1xf32>
    %cst_41 = arith.constant 1.000000e+00 : f32
    %76 = vector.broadcast %cst_41 : f32 to vector<8x1xf32>
    %77 = arith.divf %76, %75 : vector<8x1xf32>
    %78 = vector.extract_strided_slice %6 {offsets = [0, 16], sizes = [8, 8], strides = [1, 1]} : vector<8x32xf32> to vector<8x8xf32>
    %cst_42 = arith.constant dense<0.000000e+00> : vector<8x8xf32>
    %79 = tpu.matmul %73, %78, %cst_42 {dimension_numbers = #tpu.dot_dimension_numbers<[1], [0], [0], [1], [0, 0, 1, 1], [], []>} : vector<8x8xf32>, vector<8x8xf32>, vector<8x8xf32> -> vector<8x8xf32>
    %80 = vector.broadcast %77 : vector<8x1xf32> to vector<8x8xf32>
    %81 = arith.mulf %79, %80 : vector<8x8xf32>
    %c0_43 = arith.constant 0 : index
    %c0_44 = arith.constant 0 : index
    %c16 = arith.constant 16 : index
    %82 = vector.load %arg7[%c0_43, %c0_44, %c16] : memref<1x8x32xf32, #tpu.memory_space<vmem>>, vector<1x8x8xf32>
    %83 = vector.shape_cast %82 : vector<1x8x8xf32> to vector<8x8xf32>
    %84 = vector.shape_cast %81 : vector<8x8xf32> to vector<1x8x8xf32>
    tpu.vector_store %arg7[%c0_43, %c0_44, %c16], %84 {strides = array<i32>} : memref<1x8x32xf32, #tpu.memory_space<vmem>>, vector<1x8x8xf32>,
    %85 = arith.extui %12 : i1 to i32
    %c0_i32_45 = arith.constant 0 : i32
    %86 = arith.cmpi ne, %85, %c0_i32_45 : i32
    scf.if %86 {
      %110 = vector.extract_strided_slice %8 {offsets = [0, 16], sizes = [8, 8], strides = [1, 1]} : vector<8x32xf32> to vector<8x8xf32>
      %cst_55 = arith.constant dense<0.000000e+00> : vector<8x8xf32>
      %111 = tpu.matmul %73, %110, %cst_55 {dimension_numbers = #tpu.dot_dimension_numbers<[1], [0], [0], [1], [0, 0, 1, 1], [], []>} : vector<8x8xf32>, vector<8x8xf32>, vector<8x8xf32> -> vector<8x8xf32>
      %112 = vector.shape_cast %17 : vector<8x1xi1> to vector<8x1xi1>
      %113 = vector.broadcast %112 : vector<8x1xi1> to vector<8x8xi1>
      %114 = arith.select %113, %111, %79 : vector<8x8xi1>, vector<8x8xf32>
      %115 = vector.broadcast %77 : vector<8x1xf32> to vector<8x8xf32>
      %116 = arith.mulf %114, %115 : vector<8x8xf32>
      %c0_56 = arith.constant 0 : index
      %c0_57 = arith.constant 0 : index
      %c16_58 = arith.constant 16 : index
      %117 = vector.load %arg7[%c0_56, %c0_57, %c16_58] : memref<1x8x32xf32, #tpu.memory_space<vmem>>, vector<1x8x8xf32>
      %118 = vector.shape_cast %117 : vector<1x8x8xf32> to vector<8x8xf32>
      %119 = vector.shape_cast %116 : vector<8x8xf32> to vector<1x8x8xf32>
      tpu.vector_store %arg7[%c0_56, %c0_57, %c16_58], %119 {strides = array<i32>} : memref<1x8x32xf32, #tpu.memory_space<vmem>>, vector<1x8x8xf32>,
    } else {
    }
    %87 = vector.extract_strided_slice %2 {offsets = [0, 24], sizes = [8, 8], strides = [1, 1]} : vector<8x32xf32> to vector<8x8xf32>
    %88 = vector.extract_strided_slice %4 {offsets = [0, 24], sizes = [8, 8], strides = [1, 1]} : vector<8x32xf32> to vector<8x8xf32>
    %cst_46 = arith.constant dense<0.000000e+00> : vector<8x8xf32>
    %89 = tpu.matmul %87, %88, %cst_46 {dimension_numbers = #tpu.dot_dimension_numbers<[1], [1], [0], [0], [0, 0, 1, 0], [], []>} : vector<8x8xf32>, vector<8x8xf32>, vector<8x8xf32> -> vector<8x8xf32>
    %cst_47 = arith.constant 0.353553385 : f32
    %90 = vector.broadcast %cst_47 : f32 to vector<8x8xf32>
    %91 = arith.mulf %89, %90 : vector<8x8xf32>
    %cst_48 = arith.constant dense<0xFF800000> : vector<8xf32>
    %92 = vector.multi_reduction <maximumf>, %91, %cst_48 [1] : vector<8x8xf32> to vector<8xf32>
    %93 = vector.shape_cast %92 : vector<8xf32> to vector<8x1xf32>
    %94 = vector.broadcast %93 : vector<8x1xf32> to vector<8x8xf32>
    %95 = arith.subf %91, %94 : vector<8x8xf32>
    %96 = math.exp %95 : vector<8x8xf32>
    %cst_49 = arith.constant dense<0.000000e+00> : vector<8xf32>
    %97 = vector.multi_reduction <add>, %96, %cst_49 [1] : vector<8x8xf32> to vector<8xf32>
    %98 = vector.shape_cast %97 : vector<8xf32> to vector<8x1xf32>
    %cst_50 = arith.constant 1.000000e+00 : f32
    %99 = vector.broadcast %cst_50 : f32 to vector<8x1xf32>
    %100 = arith.divf %99, %98 : vector<8x1xf32>
    %101 = vector.extract_strided_slice %6 {offsets = [0, 24], sizes = [8, 8], strides = [1, 1]} : vector<8x32xf32> to vector<8x8xf32>
    %cst_51 = arith.constant dense<0.000000e+00> : vector<8x8xf32>
    %102 = tpu.matmul %96, %101, %cst_51 {dimension_numbers = #tpu.dot_dimension_numbers<[1], [0], [0], [1], [0, 0, 1, 1], [], []>} : vector<8x8xf32>, vector<8x8xf32>, vector<8x8xf32> -> vector<8x8xf32>
    %103 = vector.broadcast %100 : vector<8x1xf32> to vector<8x8xf32>
    %104 = arith.mulf %102, %103 : vector<8x8xf32>
    %c0_52 = arith.constant 0 : index
    %c0_53 = arith.constant 0 : index
    %c24 = arith.constant 24 : index
    %105 = vector.load %arg7[%c0_52, %c0_53, %c24] : memref<1x8x32xf32, #tpu.memory_space<vmem>>, vector<1x8x8xf32>
    %106 = vector.shape_cast %105 : vector<1x8x8xf32> to vector<8x8xf32>
    %107 = vector.shape_cast %104 : vector<8x8xf32> to vector<1x8x8xf32>
    tpu.vector_store %arg7[%c0_52, %c0_53, %c24], %107 {strides = array<i32>} : memref<1x8x32xf32, #tpu.memory_space<vmem>>, vector<1x8x8xf32>,
    %108 = arith.extui %12 : i1 to i32
    %c0_i32_54 = arith.constant 0 : i32
    %109 = arith.cmpi ne, %108, %c0_i32_54 : i32
    scf.if %109 {
      %110 = vector.extract_strided_slice %8 {offsets = [0, 24], sizes = [8, 8], strides = [1, 1]} : vector<8x32xf32> to vector<8x8xf32>
      %cst_55 = arith.constant dense<0.000000e+00> : vector<8x8xf32>
      %111 = tpu.matmul %96, %110, %cst_55 {dimension_numbers = #tpu.dot_dimension_numbers<[1], [0], [0], [1], [0, 0, 1, 1], [], []>} : vector<8x8xf32>, vector<8x8xf32>, vector<8x8xf32> -> vector<8x8xf32>
      %112 = vector.shape_cast %17 : vector<8x1xi1> to vector<8x1xi1>
      %113 = vector.broadcast %112 : vector<8x1xi1> to vector<8x8xi1>
      %114 = arith.select %113, %111, %102 : vector<8x8xi1>, vector<8x8xf32>
      %115 = vector.broadcast %100 : vector<8x1xf32> to vector<8x8xf32>
      %116 = arith.mulf %114, %115 : vector<8x8xf32>
      %c0_56 = arith.constant 0 : index
      %c0_57 = arith.constant 0 : index
      %c24_58 = arith.constant 24 : index
      %117 = vector.load %arg7[%c0_56, %c0_57, %c24_58] : memref<1x8x32xf32, #tpu.memory_space<vmem>>, vector<1x8x8xf32>
      %118 = vector.shape_cast %117 : vector<1x8x8xf32> to vector<8x8xf32>
      %119 = vector.shape_cast %116 : vector<8x8xf32> to vector<1x8x8xf32>
      tpu.vector_store %arg7[%c0_56, %c0_57, %c24_58], %119 {strides = array<i32>} : memref<1x8x32xf32, #tpu.memory_space<vmem>>, vector<1x8x8xf32>,
    } else {
    }
    return
  }
  func.func @transform_0(%arg0: i32, %arg1: i32, %arg2: i32) -> (i32, i32, i32, i32) {
    %c0_i32 = arith.constant 0 : i32
    %c0_i32_0 = arith.constant 0 : i32
    return %arg0, %arg1, %arg2, %c0_i32 : i32, i32, i32, i32
  }
  func.func @transform_1(%arg0: i32, %arg1: i32, %arg2: i32) -> (i32, i32, i32, i32) {
    %c0_i32 = arith.constant 0 : i32
    %c0_i32_0 = arith.constant 0 : i32
    %c0_i32_1 = arith.constant 0 : i32
    return %arg0, %arg1, %c0_i32, %c0_i32_0 : i32, i32, i32, i32
  }
  func.func @transform_2(%arg0: i32, %arg1: i32, %arg2: i32) -> (i32, i32, i32, i32, i32) {
    %c8_i32 = arith.constant 8 : i32
    %0 = arith.muli %arg2, %c8_i32 : i32
    %c5_i32 = arith.constant 5 : i32
    %1 = arith.cmpi sge, %0, %c5_i32 : i32
    %c1_i32 = arith.constant 1 : i32
    %c0_i32 = arith.constant 0 : i32
    %2 = arith.select %1, %c1_i32, %c0_i32 : i32
    %c0_i32_0 = arith.constant 0 : i32
    %c0_i32_1 = arith.constant 0 : i32
    %c0_i32_2 = arith.constant 0 : i32
    return %2, %arg0, %arg1, %c0_i32_0, %c0_i32_1 : i32, i32, i32, i32, i32
  }
  func.func @transform_3(%arg0: i32, %arg1: i32, %arg2: i32) -> (i32, i32, i32, i32, i32) {
    %c1_i32 = arith.constant 1 : i32
    %0 = arith.addi %arg2, %c1_i32 : i32
    %c8_i32 = arith.constant 8 : i32
    %1 = arith.muli %0, %c8_i32 : i32
    %c5_i32 = arith.constant 5 : i32
    %2 = arith.cmpi sgt, %1, %c5_i32 : i32
    %c1_i32_0 = arith.constant 1 : i32
    %c0_i32 = arith.constant 0 : i32
    %3 = arith.select %2, %c1_i32_0, %c0_i32 : i32
    %c0_i32_1 = arith.constant 0 : i32
    %c0_i32_2 = arith.constant 0 : i32
    %c0_i32_3 = arith.constant 0 : i32
    return %3, %arg0, %arg1, %c0_i32_1, %c0_i32_2 : i32, i32, i32, i32, i32
  }
  func.func @transform_4(%arg0: i32, %arg1: i32, %arg2: i32) -> (i32, i32, i32) {
    %c0_i32 = arith.constant 0 : i32
    return %arg0, %arg2, %arg1 : i32, i32, i32
  }
}

</mosaic_0001>

<bundles_post_ra>
// kernel: attention_multi_doublevalue.3
= control target key start
LH: loop header
LB: loop body
LE: loop exit
PB: predicated region body
PF: predicated region fallthrough
CT: control target
= control target key end

     0   :  { %7 = vsyncpa [#allocation4], 0  ;;  %s280_s0 = inlined_call_operand.hbm [shape: f32[16,32], index: 0, kind: input, shape index: {}]   ;;  %s281_s1 = inlined_call_operand.hbm [shape: f32[32,128], index: 1, kind: input, shape index: {}]   ;;  %s282_s2 = inlined_call_operand.vmem [shape: f32[16,128], index: 2, kind: output, shape index: {}]  }
   0x1   :  { %8 = vsyncpa [#allocation6], 0  ;;  %s231_s9 = smov [#allocation3]   ;;  %s183_s13 = scalar_lea.hbm %s280_s0, 256 }
   0x2   :  { %s14_s10 = sshll.u32 %s231_s9, 4  ;;  %p184_p0 = scmp.ne.s32.totalorder %s280_s0, %s183_s13  ;;  %s15_s10 = int_to_ptr.vmem [resolvable:$true] %s14_s10 }
   0x3   :  { %p187_p1 = scmp.lt.u32.totalorder %s183_s13, %s280_s0 }
   0x5   :  { %p189_p2 = pnand %p187_p1, %p184_p0 }
   0x7   :  { %192 = shalt.err (!%p189_p2)
}
   0x8   :  { %s193_s18 = scalar_lea.vmem %s15_s10, 256  ;;  %p198_p4 = scmp.lt.s32.totalorder %s15_s10, %s15_s10 }
   0x9   :  { %p194_p3 = scmp.ne.s32.totalorder %s15_s10, %s193_s18  ;;  %p199_p5 = scmp.lt.s32.totalorder %s193_s18, %s193_s18 }
   0xb   :  { %p200_p6 = por %p199_p5, %p198_p4 }
   0xd   :  { %p201_p7 = pnand %p200_p6, %p194_p3 }
   0xf   :  { %204 = shalt.err (!%p201_p7)
}
  0x10   :  { %s232_s19 = smov 128   ;;  %s233_s20 = smov 8  }
  0x11   :  { %20 = dma.hbm_to_vmem [thread:$0]  %s280_s0, 256, %s15_s10, [#allocation4], %s232_s19, %s232_s19, %s233_s20  }
  0x12   :  { %s234_s23 = smov [#allocation5]   ;;  %s205_s27 = scalar_lea.hbm %s281_s1, 512 }
  0x13   :  { %s26_s24 = sshll.u32 %s234_s23, 4  ;;  %p206_p8 = scmp.ne.s32.totalorder %s281_s1, %s205_s27  ;;  %s27_s24 = int_to_ptr.vmem [resolvable:$true] %s26_s24 }
  0x14   :  { %p209_p9 = scmp.lt.u32.totalorder %s205_s27, %s281_s1 }
  0x16   :  { %p211_p10 = pnand %p209_p9, %p206_p8 }
  0x18   :  { %214 = shalt.err (!%p211_p10)
}
  0x19   :  { %s215_s4 = scalar_lea.vmem %s27_s24, 512  ;;  %p220_p12 = scmp.lt.s32.totalorder %s27_s24, %s27_s24 }
  0x1a   :  { %p216_p11 = scmp.ne.s32.totalorder %s27_s24, %s215_s4  ;;  %p221_p13 = scmp.lt.s32.totalorder %s215_s4, %s215_s4 }
  0x1c   :  { %p222_p0 = por %p221_p13, %p220_p12 }
  0x1e   :  { %p223_p1 = pnand %p222_p0, %p216_p11 }
  0x20   :  { %226 = shalt.err (!%p223_p1)
}
  0x21   :  { %32 = dma.hbm_to_vmem [thread:$0]  %s281_s1, 512, %s27_s24, [#allocation6], %s232_s19, %s232_s19, %s233_s20  }
  0x22   :  { %227 = dma.done.wait [#allocation4], 256  }
  0x23   :  { %228 = vsyncadd [#allocation4], 4294967040 }
  0x24   :  { %229 = dma.done.wait [#allocation6], 512  }
  0x25   :  { %230 = vsyncadd [#allocation6], 4294966784  ;;  %vm53_vm0 = vcmask 261120   ;;  %v49_v0 = vld [vmem:[#allocation5] sm:$0xff]  ;;  %v50_v1 = vld [vmem:[#allocation5 + $0x8] sm:$0xff] }
  0x26   :  { %v51_v2 = vld [vmem:[#allocation5 + $0x10] sm:$0xff]  ;;  %v171_v3 = vpack.c.bf16 %v50_v1, %v49_v0  ;;  %v52_v4 = vld [vmem:[#allocation5 + $0x18] sm:$0xff] }
  0x27   :  { %v47_v5 = vld [vmem:[#allocation3] sm:$0xff]  ;;  %v175_v6 = vpack.c.bf16 %v52_v4, %v51_v2  ;;  %v48_v7 = vld [vmem:[#allocation3 + $0x8] sm:$0xff] }
  0x28   :  { %168 = vmatprep.mubr.msk.f32.mxu0 %vm53_vm0, %v47_v5  ;;  %172 = vmatprep.subr.bf16.mxu0 %v171_v3 }
  0x29   :  { %174 = vmatpush3.bf16.msra.mxu0 %v171_v3 }
  0x2a   :  { %176 = vmatprep.subr.bf16.mxu0 %v175_v6 }
  0x2d   :  { %178 = vmatpush3.bf16.msra.mxu0 %v175_v6 }
  0x30   :  { %169 = vmatmul.mubr.msk.f32.vlgmr.msra.gmra.mrb[0].mxu0 %vm53_vm0, %v48_v7 }
 0x103   :  { %v170_v8 = vpop.f32.mrb[0].mxu0 }
 0x104   :  { %145 = vst [vmem:[%s282_s2 + $0x8] sm:$0xff] %v170_v8  ;;  %v126_v9 = vpop.f32.mrb[1].mxu0 }
 0x105   :  { %144 = vst [vmem:[%s282_s2] sm:$0xff] %v126_v9 }
 0x106   :  { %150 = vsyncpa [#allocation4], 1 }
 0x107   :  { %151 = vsyncpa [#allocation6], 1 }

// kernel: attention_multi_doublevalue.5
= control target key start
LH: loop header
LB: loop body
LE: loop exit
PB: predicated region body
PF: predicated region fallthrough
CT: control target
= control target key end

     0   :  { %vm19_vm0 = vcmask 261120   ;;  %v204_v6 = vmov 0.0   ;;  %s269_s0 = inlined_call_operand.vmem [shape: f32[16,32], index: 0, kind: input, shape index: {}]   ;;  %s270_s1 = inlined_call_operand.vmem [shape: f32[32,32], index: 1, kind: input, shape index: {}]   ;;  %s271_s2 = inlined_call_operand.vmem [shape: f32[1,32], index: 2, kind: input, shape index: {}]   ;;  %s272_s3 = inlined_call_operand.hbm [shape: f32[16,32], index: 3, kind: output, shape index: {}]  }
   0x1   :  { %v26_v0 = vld [vmem:[%s270_s1] sm:$0xff]  ;;  %v27_v1 = vld [vmem:[%s270_s1 + $0x8] sm:$0xff]  ;;  %v28_v2 = vld [vmem:[%s270_s1 + $0x10] sm:$0xff]  ;;  %21 = vst.msk [vmem:[#allocation2 + $0x8] sm:$0xff] %vm19_vm0, %v204_v6 }
   0x2   :  { %v168_v3 = vpack.c.bf16 %v27_v1, %v26_v0  ;;  %v29_v4 = vld [vmem:[%s270_s1 + $0x18] sm:$0xff]  ;;  %v24_v5 = vld [vmem:[%s269_s0] sm:$0xff]  ;;  %20 = vst.msk [vmem:[#allocation2] sm:$0xff] %vm19_vm0, %v204_v6 }
   0x3   :  { %v172_v7 = vpack.c.bf16 %v29_v4, %v28_v2  ;;  %165 = vmatprep.mubr.msk.f32.mxu0 %vm19_vm0, %v24_v5 }
   0x4   :  { %8 = vsyncpa [#allocation4], 0  ;;  %169 = vmatprep.subr.bf16.mxu0 %v168_v3  ;;  %v25_v8 = vld [vmem:[%s269_s0 + $0x8] sm:$0xff]  ;;  %v150_v15 = vld [vmem:[%s271_s2] ss:$0 sm:$0xff]  ;;  %s205_s25 = smov [#allocation3]  }
   0x5   :  { %171 = vmatpush3.bf16.msra.mxu0 %v168_v3  ;;  %s137_s26 = sshll.u32 %s205_s25, 4  ;;  %s138_s26 = int_to_ptr.vmem [resolvable:$true] %s137_s26 }
   0x6   :  { %173 = vmatprep.subr.bf16.mxu0 %v172_v7  ;;  %s180_s0 = scalar_lea.vmem %s138_s26, 256  ;;  %p185_p1 = scmp.lt.s32.totalorder %s138_s26, %s138_s26 }
   0x7   :  { %p181_p0 = scmp.ne.s32.totalorder %s138_s26, %s180_s0  ;;  %p186_p2 = scmp.lt.s32.totalorder %s180_s0, %s180_s0 }
   0x8   :  { %v23_v9 = vld [vmem:[#allocation2 + $0x8] sm:$0xff] }
   0x9   :  { %175 = vmatpush3.bf16.msra.mxu0 %v172_v7  ;;  %v22_v10 = vld [vmem:[#allocation2] sm:$0xff]  ;;  %p187_p3 = por %p186_p2, %p185_p1 }
   0xb   :  { %p188_p4 = pnand %p187_p3, %p181_p0 }
   0xc   :  { %166 = vmatmul.mubr.msk.f32.vlgmr.msra.gmra.mrb[0].mxu0 %vm19_vm0, %v25_v8 }
  0xdf   :  { %v167_v11 = vpop.f32.mrb[0].mxu0 }
  0xe0   :  { %v113_v12 = vadd.f32 %v167_v11, %v23_v9  ;;  %v103_v13 = vpop.f32.mrb[1].mxu0 }
  0xe1   :  { %v112_v14 = vadd.f32 %v103_v13, %v22_v10 }
  0xe2   :  { %115 = vst.msk [vmem:[#allocation2 + $0x8] sm:$0xff] %vm19_vm0, %v113_v12 }
  0xe3   :  { %114 = vst.msk [vmem:[#allocation2] sm:$0xff] %vm19_vm0, %v112_v14 }
  0xe9   :  { %v120_v16 = vld [vmem:[#allocation2 + $0x8] sm:$0xff] }
  0xea   :  { %v119_v17 = vld [vmem:[#allocation2] sm:$0xff]  ;;  %v129_v18 = vadd.f32 %v150_v15, %v120_v16 }
  0xeb   :  { %v128_v19 = vadd.f32 %v150_v15, %v119_v17 }
  0xec   :  { %131 = vst.msk [vmem:[#allocation3 + $0x8] sm:$0xff] %vm19_vm0, %v129_v18 }
  0xed   :  { %130 = vst.msk [vmem:[#allocation3] sm:$0xff] %vm19_vm0, %v128_v19 }
  0xee   :  { %191 = shalt.err (!%p188_p4)
}
  0xef   :  { %s192_s28 = scalar_lea.hbm %s272_s3, 256 }
  0xf0   :  { %p193_p5 = scmp.ne.s32.totalorder %s272_s3, %s192_s28  ;;  %p196_p6 = scmp.lt.u32.totalorder %s192_s28, %s272_s3 }
  0xf2   :  { %p198_p7 = pnand %p196_p6, %p193_p5 }
  0xf4   :  { %201 = shalt.err (!%p198_p7)
}
  0xf5   :  { %s206_s6 = smov 128   ;;  %s207_s7 = smov 8  }
  0xf6   :  { %143 = dma.vmem_to_hbm [thread:$0]  %s138_s26, 256, %s272_s3, [#allocation4], %s206_s6, %s206_s6, %s207_s7  }
  0xf7   :  { %202 = dma.done.wait [#allocation4], 256  }
  0xf8   :  { %203 = vsyncadd [#allocation4], 4294967040 }
  0xf9   :  { %147 = vsyncpa [#allocation4], 1 }

// kernel: attention_multi_doublevalue.4
= control target key start
LH: loop header
LB: loop body
LE: loop exit
PB: predicated region body
PF: predicated region fallthrough
CT: control target
= control target key end

     0   :  { %s1808_s15 = smov 0   ;;  %s1810_s16 = smov 0   ;;  %s1975_s0 = inlined_call_operand.vmem [shape: f32[2,1,8,32], index: 0, kind: input, shape index: {}]   ;;  %s1976_s1 = inlined_call_operand.vmem [shape: f32[2,1,8,32], index: 1, kind: input, shape index: {}]   ;;  %s1977_s2 = inlined_call_operand.vmem [shape: f32[2,2,1,8,32], index: 2, kind: input, shape index: {}, may-alias: {2,3}]   ;;  %s1978_s3 = inlined_call_operand.vmem [shape: f32[2,2,1,8,32], index: 3, kind: input, shape index: {}, may-alias: {2,3}]   ;;  %s1979_s4 = inlined_call_operand.vmem [shape: f32[2,8,32], index: 4, kind: output, shape index: {}]  }
   0x1   :  { %s1812_s17 = smov 0  }
   0x2 LB: > { %s33_s18 = sadd.s32 1, %s1769_s16  ;;  %p1593_p0 = scmp.ge.s32.totalorder %s1773_s17, 1  ;;  %s1773_s17 = sphi %s1812_s17, %s14_s17   ;;  %s1769_s16 = sphi %s1810_s16, %s1981_s16   ;;  %s1765_s15 = sphi %s1808_s15, %s1980_s15  }
   0x3   : > { %p35_p1 = scmp.ge.s32.totalorder %s33_s18, 2  ;;  %p276_p2 = scmp.lt.s32.totalorder %s1773_s17, 3 }
   0x5   : > { %s1983_s18 = smov (%p35_p1, %s33_s18), 0  ;;  %p277_p3 = pnand %p1593_p0, %p276_p2 }
   0x6   : > { %p348_p4 = scmp.lt.s32.totalorder (!%p277_p3), %s1765_s15, 1  ;;  %v1775_v0 = vmov (!%p277_p3), 0.0   ;;  %vm1776_vm0 = vmmov (!%p277_p3), 0   ;;  %vm426_vm1 = vcmask (!%p277_p3), 64512   ;;  %s1777_s26 = smov (!%p277_p3), 120   ;;  %v421_v27 = vlaneseq (!%p277_p3) }
   0x7   : > { %280 = sbr.rel (%p277_p3) target bundleno = 1595 (0x63b), region = 36  ;;  %1643 = vmatprep.subr.mxu0 (!%p277_p3), %v1775_v0  ;;  %1645 = vmatprep.mubr.msk.f32.mxu0 (!%p277_p3), %vm1776_vm0, %v1775_v0  ;;  %s1778_s30 = smov (!%p277_p3), 112   ;;  %vm839_vm3 = vcmask (!%p277_p3), 130112   ;;  %vm1097_vm4 = vcmask (!%p277_p3), 195712   ;;  %vm1355_vm5 = vcmask (!%p277_p3), 261312  }
   0x8   : > { %1648 = vmatprep.subr.mxu1 (!%p277_p3), %v1775_v0  ;;  %1650 = vmatprep.mubr.msk.f32.mxu1 (!%p277_p3), %vm1776_vm0, %v1775_v0  ;;  %v1909_v28 = vshrl.u32 (!%p277_p3), %v421_v27, 7  ;;  %s1779_s9 = smov (!%p277_p3), 104   ;;  %s1780_s10 = smov (!%p277_p3), 16  }
   0x9   : > { %s1781_s11 = smov (!%p277_p3), 8  }
   0xa   : > { %vm425_vm2 = vcmp.ge.s32.totalorder (!%p277_p3), %v1909_v28, 5 }
   0xe   : > { %s1985_s15 = smov (!%p348_p4, %s1765_s15), 1 }
   0xf   : > { %s1832_s19 = sshll.u32 %s1985_s15, 3  ;;  %s1782_s15 = smov 24  }
  0x10   : > { %s364_s22 = scalar_lea.vmem %s1976_s1, %s1832_s19  ;;  %s357_s25 = scalar_lea.vmem %s1975_s0, %s1832_s19 }
  0x11   : > { %v1838_v1 = vld [vmem:[%s364_s22] sm:$0xff]  ;;  %s378_s29 = scalar_lea.vmem %s1977_s2, %s1832_s19  ;;  %s1618_s5 = sadd.s32 16, %s1832_s19 }
  0x12   : > { %669 = vrot.lane.b32.xlu0 %v1838_v1, %s1777_s26  ;;  %1644 = vmatpush3.xpose.msk.msra.mxu0 %vm426_vm1, %v1838_v1  ;;  %v1848_v2 = vld [vmem:[%s357_s25] sm:$0xff]  ;;  %s396_s8 = scalar_lea.vmem %s1978_s3, %s1618_s5  ;;  %s410_s14 = scalar_lea.vmem %s1979_s4, %s1832_s19 }
  0x13   : > { %1658 = vmatprep.subr.mxu0 %v1775_v0  ;;  %v1867_v9 = vld [vmem:[%s378_s29] sm:$0xff] }
  0x14   : > { %1649 = vmatpush3.msra.mxu1 %v1867_v9  ;;  %v415_v14 = vld [vmem:[%s396_s8] sm:$0xff] }
  0x15   : > { %1646 = vmatmul.mubr.msk.f32.vlgmr.msra.gmra.mrb[0].mxu0 %vm426_vm1, %v1848_v2  ;;  %1653 = vmatprep.subr.mxu1 %v1775_v0 }
  0x16   : > { %667 = vrot.lane.b32.xlu0 %v1848_v2, %s1777_s26  ;;  %1660 = vmatprep.mubr.msk.f32.mxu0 %vm1776_vm0, %v1775_v0 }
  0x1a   : > { %758 = vrot.lane.b32.xlu0 %v1867_v9, %s1777_s26 }
  0x1e   : > { %926 = vrot.lane.b32.xlu0 %v1848_v2, %s1778_s30 }
  0x84   : > { %v670_v3 = vpop.permute.xlu0 %669 }
  0x85   : > { %1659 = vmatpush3.xpose.msk.msra.mxu0 %vm426_vm1, %v670_v3 }
  0x86   : > { %1668 = vmatprep.subr.mxu0 %v1775_v0 }
  0x88   : > { %v668_v4 = vpop.permute.xlu0 %667 }
  0x89   : > { %1661 = vmatmul.mubr.msk.f32.vlgmr.msra.gmra.mrb[2].mxu0 %vm426_vm1, %v668_v4 }
  0x8a   : > { %1670 = vmatprep.mubr.msk.f32.mxu0 %vm1776_vm0, %v1775_v0 }
  0x8c   : > { %v759_v19 = vpop.permute.xlu0 %758 }
  0x90   : > { %v927_v26 = vpop.permute.xlu0 %926 }
  0xe8   : > { %v499_v5 = vpop.f32.mrb[0].mxu0 }
  0xe9   : > { %v503_v6 = vmul.f32 0.35355338, %v499_v5  ;;  %v1647_v7 = vpop.f32.mrb[1].mxu0 }
  0xeb   : > { %v504_v8 = vsel %vm426_vm1, %v503_v6, -inf }
  0xec   : > { %505 = vmax.xlane.f32.xlu1 %v504_v8 }
 0x15c   : > { %v741_v10 = vpop.f32.mrb[2].mxu0 }
 0x15d   : > { %v745_v11 = vmul.f32 0.35355338, %v741_v10  ;;  %v1662_v12 = vpop.f32.mrb[3].mxu0 }
 0x15f   : > { %v746_v13 = vsel %vm426_vm1, %v745_v11, -inf }
 0x160   : > { %747 = vmax.xlane.f32.xlu1 %v746_v13 }
 0x171   : > { %928 = vrot.lane.b32.xlu1 %v1838_v1, %s1778_s30 }
 0x175   : > { %844 = vrot.lane.b32.xlu1 %v415_v14, %s1777_s26 }
 0x179   : > { %v506_v15 = vpop.xlane.xlu1 %505  ;;  %1016 = vrot.lane.b32.xlu1 %v1867_v9, %s1778_s30 }
 0x17a   : > { %v507_v16 = vsub.f32 %v503_v6, %v506_v15 }
 0x17c   : > { %v508_v17 = vmul.f32 1.442695, %v507_v16 }
 0x17d   : > { %1186 = vrot.lane.b32.xlu1 %v1838_v1, %s1779_s9 }
 0x17e   : > { %1735 = vpow2.f32 %v508_v17 }
 0x181   : > { %1184 = vrot.lane.b32.xlu1 %v1848_v2, %s1779_s9 }
 0x188   : > { %v1885_v18 = vpop.eup %1735 }
 0x189   : > { %1651 = vmatmul.mubr.msk.f32.vlgmr.msra.gmra.mrb[0].mxu1 %vm426_vm1, %v1885_v18 }
 0x18a   : > { %1654 = vmatpush3.msra.mxu1 %v415_v14  ;;  %1655 = vmatprep.mubr.msk.f32.mxu1 %vm1776_vm0, %v1775_v0 }
 0x18b   : > { %1663 = vmatprep.subr.mxu1 %v1775_v0 }
 0x18d   : > { %1656 = vmatmul.mubr.msk.f32.vlgmr.msra.gmra.mrb[2].mxu1 %vm426_vm1, %v1885_v18 }
 0x18e   : > { %1664 = vmatpush3.msra.mxu1 %v759_v19  ;;  %1665 = vmatprep.mubr.msk.f32.mxu1 %vm1776_vm0, %v1775_v0 }
 0x18f   : > { %1673 = vmatprep.subr.mxu1 %v1775_v0 }
 0x1ed   : > { %v748_v20 = vpop.xlane.xlu1 %747 }
 0x1ee   : > { %v749_v21 = vsub.f32 %v745_v11, %v748_v20 }
 0x1f0   : > { %v750_v22 = vmul.f32 1.442695, %v749_v21 }
 0x1f1   : > { %v929_v23 = vpop.permute.xlu1 %928 }
 0x1f2   : > { %1737 = vpow2.f32 %v750_v22 }
 0x1f5   : > { %v845_v24 = vpop.permute.xlu1 %844 }
 0x1f6   : > { %1669 = vmatpush3.msra.mxu0 %v845_v24 }
 0x1f7   : > { %1678 = vmatprep.subr.mxu0 %v1775_v0 }
 0x1f9   : > { %v1017_v43 = vpop.permute.xlu1 %1016 }
 0x1fc   : > { %v1738_v25 = vpop.eup %1737 }
 0x1fd   : > { %1666 = vmatmul.mubr.msk.f32.vlgmr.msra.gmra.mrb[4].mxu1 %vm426_vm1, %v1738_v25  ;;  %1671 = vmatmul.mubr.msk.f32.vlgmr.msra.gmra.mrb[4].mxu0 %vm426_vm1, %v1738_v25  ;;  %v752_v44 = vsel %vm426_vm1, %v1738_v25, 0.0  ;;  %v1187_v49 = vpop.permute.xlu1 %1186 }
 0x1fe   : > { %1674 = vmatpush3.xpose.msk.msra.mxu1 %vm426_vm1, %v929_v23  ;;  %1675 = vmatprep.mubr.msk.f32.mxu1 %vm1776_vm0, %v1775_v0 }
 0x1ff   : > { %1683 = vmatprep.subr.mxu1 %v1775_v0  ;;  %1680 = vmatprep.mubr.msk.f32.mxu0 %vm1776_vm0, %v1775_v0 }
 0x200   : > { %1679 = vmatpush3.msra.mxu0 %v1017_v43 }
 0x201   : > { %1676 = vmatmul.mubr.msk.f32.vlgmr.msra.gmra.mrb[6].mxu1 %vm426_vm1, %v927_v26  ;;  %1688 = vmatprep.subr.mxu0 %v1775_v0  ;;  %v1185_v52 = vpop.permute.xlu1 %1184 }
 0x202   : > { %1685 = vmatprep.mubr.msk.f32.mxu1 %vm1776_vm0, %v1775_v0 }
 0x25c   : > { %v1911_v29 = vpop.f32.mrb[0].mxu1 }
 0x25d   : > { %v1652_v30 = vpop.f32.mrb[1].mxu1 }
 0x260   : > { %v658_v31 = vpop.f32.mrb[2].mxu1 }
 0x261   : > { %v1917_v32 = vsel %vm425_vm2, %v658_v31, %v1911_v29  ;;  %v1657_v33 = vpop.f32.mrb[3].mxu1 }
 0x2d0   : > { %v1921_v34 = vpop.f32.mrb[4].mxu1  ;;  %v913_v35 = vpop.f32.mrb[4].mxu0 }
 0x2d1   : > { %v1926_v36 = vsel %vm425_vm2, %v913_v35, %v1921_v34  ;;  %v1667_v37 = vpop.f32.mrb[5].mxu1  ;;  %v1672_v38 = vpop.f32.mrb[5].mxu0 }
 0x2d4   : > { %v1000_v39 = vpop.f32.mrb[6].mxu1 }
 0x2d5   : > { %v1004_v40 = vmul.f32 0.35355338, %v1000_v39  ;;  %v1677_v41 = vpop.f32.mrb[7].mxu1 }
 0x2d7   : > { %v1005_v42 = vsel %vm426_vm1, %v1004_v40, -inf }
 0x2d8   : > { %1006 = vmax.xlane.f32.xlu0 %v1005_v42 }
 0x2ee   : > { %1102 = vrot.lane.b32.xlu0 %v415_v14, %s1778_s30 }
 0x2f2   : > { %1274 = vrot.lane.b32.xlu0 %v1867_v9, %s1779_s9  ;;  %v510_v9 = vsel %vm426_vm1, %v1885_v18, 0.0 }
 0x2f6   : > { %1360 = vrot.lane.b32.xlu0 %v415_v14, %s1779_s9 }
 0x315   : > { %753 = vadd.xlane.f32.xlu0 %v752_v44 }
 0x365   : > { %v1007_v45 = vpop.xlane.xlu0 %1006 }
 0x366   : > { %v1008_v46 = vsub.f32 %v1004_v40, %v1007_v45 }
 0x368   : > { %v1009_v47 = vmul.f32 1.442695, %v1008_v46 }
 0x369   : > { %v1103_v48 = vpop.permute.xlu0 %1102 }
 0x36a   : > { %1739 = vpow2.f32 %v1009_v47  ;;  %1684 = vmatpush3.msra.mxu1 %v1103_v48 }
 0x36b   : > { %1693 = vmatprep.subr.mxu1 %v1775_v0 }
 0x36d   : > { %v1275_v50 = vpop.permute.xlu0 %1274 }
 0x371   : > { %v1361_v53 = vpop.permute.xlu0 %1360 }
 0x374   : > { %v1740_v51 = vpop.eup %1739 }
 0x375   : > { %1681 = vmatmul.mubr.msk.f32.vlgmr.msra.gmra.mrb[6].mxu0 %vm426_vm1, %v1740_v51  ;;  %1686 = vmatmul.mubr.msk.f32.vlgmr.msra.gmra.mrb[8].mxu1 %vm426_vm1, %v1740_v51  ;;  %v1011_v63 = vsel %vm426_vm1, %v1740_v51, 0.0 }
 0x376   : > { %1689 = vmatpush3.xpose.msk.msra.mxu0 %vm426_vm1, %v1187_v49  ;;  %1690 = vmatprep.mubr.msk.f32.mxu0 %vm1776_vm0, %v1775_v0 }
 0x377   : > { %1694 = vmatpush3.msra.mxu1 %v1275_v50  ;;  %1698 = vmatprep.subr.mxu0 %v1775_v0 }
 0x378   : > { %1695 = vmatprep.mubr.msk.f32.mxu1 %vm1776_vm0, %v1775_v0 }
 0x379   : > { %1691 = vmatmul.mubr.msk.f32.vlgmr.msra.gmra.mrb[8].mxu0 %vm426_vm1, %v1185_v52 }
 0x37a   : > { %1699 = vmatpush3.msra.mxu0 %v1361_v53  ;;  %1700 = vmatprep.mubr.msk.f32.mxu0 %vm1776_vm0, %v1775_v0 }
 0x3a2   : > { %v754_v8 = vpop.xlane.xlu0 %753 }
 0x448   : > { %v1088_v54 = vpop.f32.mrb[6].mxu0  ;;  %v1171_v55 = vpop.f32.mrb[8].mxu1 }
 0x449   : > { %v1177_v56 = vsel %vm425_vm2, %v1171_v55, %v1088_v54  ;;  %v1682_v57 = vpop.f32.mrb[7].mxu0  ;;  %v1687_v58 = vpop.f32.mrb[9].mxu1 }
 0x44c   : > { %v1258_v59 = vpop.f32.mrb[8].mxu0 }
 0x44d   : > { %v1262_v60 = vmul.f32 0.35355338, %v1258_v59  ;;  %v1692_v61 = vpop.f32.mrb[9].mxu0 }
 0x44f   : > { %v1263_v62 = vsel %vm426_vm1, %v1262_v60, -inf }
 0x450   : > { %1264 = vmax.xlane.f32.xlu1 %v1263_v62 }
 0x454   : > { %1012 = vadd.xlane.f32.xlu1 %v1011_v63 }
 0x4dd   : > { %v1265_v1 = vpop.xlane.xlu1 %1264 }
 0x4de   : > { %v1266_v2 = vsub.f32 %v1262_v60, %v1265_v1 }
 0x4e0   : > { %v1267_v3 = vmul.f32 1.442695, %v1266_v2 }
 0x4e1   : > { %v1013_v0 = vpop.xlane.xlu1 %1012 }
 0x4e2   : > { %1741 = vpow2.f32 %v1267_v3 }
 0x4e3   : > { %1743 = vrcp.f32 %v1013_v0 }
 0x4e4   : > { %1745 = vrcp.f32 %v754_v8 }
 0x4ec   : > { %v1742_v4 = vpop.eup %1741 }
 0x4ed   : > { %v1744_v5 = vpop.eup %1743  ;;  %1696 = vmatmul.mubr.msk.f32.vlgmr.msra.gmra.mrb[10].mxu1 %vm426_vm1, %v1742_v4  ;;  %1701 = vmatmul.mubr.msk.f32.vlgmr.msra.gmra.mrb[10].mxu0 %vm426_vm1, %v1742_v4  ;;  %v1269_v6 = vsel %vm426_vm1, %v1742_v4, 0.0 }
 0x4ee   : > { %1270 = vadd.xlane.f32.xlu1 %v1269_v6  ;;  %v1092_v7 = vmul.f32 %v1744_v5, %v1088_v54  ;;  %v1746_v10 = vpop.eup %1745  ;;  %v1178_v13 = vmul.f32 %v1744_v5, %v1177_v56 }
 0x4ef   : > { %v834_v11 = vmul.f32 %v1746_v10, %v1921_v34  ;;  %v920_v12 = vmul.f32 %v1746_v10, %v1926_v36 }
 0x4f0   : > { %1094 = vrot.lane.b32.xlu0 %v1092_v7, %s1780_s10 }
 0x4f2   : > { %511 = vadd.xlane.f32.xlu1 %v510_v9 }
 0x503   : > { %836 = vrot.lane.b32.xlu1 %v834_v11, %s1781_s11 }
 0x507   : > { %922 = vrot.lane.b32.xlu1 %v920_v12, %s1781_s11 }
 0x50b   : > { %1180 = vrot.lane.b32.xlu1 %v1178_v13, %s1780_s10 }
 0x562   : > { %v1095_v21 = vpop.permute.xlu0 %1094 }
 0x57b   : > { %v1271_v14 = vpop.xlane.xlu1 %1270 }
 0x57f   : > { %v512_v15 = vpop.xlane.xlu1 %511 }
 0x580   : > { %1747 = vrcp.f32 %v512_v15 }
 0x581   : > { %1749 = vrcp.f32 %v1271_v14 }
 0x583   : > { %v837_v16 = vpop.permute.xlu1 %836 }
 0x587   : > { %v923_v20 = vpop.permute.xlu1 %922 }
 0x58a   : > { %v1748_v17 = vpop.eup %1747 }
 0x58b   : > { %v588_v18 = vmul.f32 %v1748_v17, %v1911_v29  ;;  %v665_v19 = vmul.f32 %v1748_v17, %v1917_v32  ;;  %v1181_v22 = vpop.permute.xlu1 %1180  ;;  %v1750_v23 = vpop.eup %1749 }
 0x58d   : > { %589 = vst.msk [vmem:[%s410_s14] sm:$0xff] %vm426_vm1, %v588_v18 }
 0x58e   : > { %666 = vst.msk [vmem:[%s410_s14] sm:$0xff] %vm426_vm1, %v665_v19 }
 0x58f   : > { %840 = vst.msk [vmem:[%s410_s14] sm:$0xff] %vm839_vm3, %v837_v16 }
 0x590   : > { %925 = vst.msk [vmem:[%s410_s14] sm:$0xff] %vm839_vm3, %v923_v20 }
 0x591   : > { %1098 = vst.msk [vmem:[%s410_s14] sm:$0xff] %vm1097_vm4, %v1095_v21 }
 0x592   : > { %1183 = vst.msk [vmem:[%s410_s14] sm:$0xff] %vm1097_vm4, %v1181_v22 }
 0x5c0   : > { %v1346_v24 = vpop.f32.mrb[10].mxu1  ;;  %v1429_v25 = vpop.f32.mrb[10].mxu0 }
 0x5c1   : > { %v1350_v26 = vmul.f32 %v1750_v23, %v1346_v24  ;;  %v1435_v27 = vsel %vm425_vm2, %v1429_v25, %v1346_v24  ;;  %v1697_v29 = vpop.f32.mrb[11].mxu1  ;;  %v1702_v30 = vpop.f32.mrb[11].mxu0 }
 0x5c2   : > { %v1436_v31 = vmul.f32 %v1750_v23, %v1435_v27 }
 0x5c3   : > { %1352 = vrot.lane.b32.xlu1 %v1350_v26, %s1782_s15 }
 0x5c7   : > { %1438 = vrot.lane.b32.xlu1 %v1436_v31, %s1782_s15 }
 0x635   : > { %v1353_v32 = vpop.permute.xlu1 %1352 }
 0x636   : > { %1356 = vst.msk [vmem:[%s410_s14] sm:$0xff] %vm1355_vm5, %v1353_v32 }
 0x639   : > { %v1439_v33 = vpop.permute.xlu1 %1438 }
 0x63a   : > { %1441 = vst.msk [vmem:[%s410_s14] sm:$0xff] %vm1355_vm5, %v1439_v33 }
 0x63b PF: > { %s14_s17 = sadd.s32 1, %s1773_s17   ;;  %s1980_s15 = smov %s1769_s16 }
 0x63c   : > { %p11_p5 = scmp.ge.s32.totalorder %s14_s17, 4   ;;  %s1981_s16 = smov %s1983_s18 }
 0x63e   :  { %13 = sbr.rel (!%p11_p5) target bundleno = 2 (0x2), region = 91 }

</bundles_post_ra>
